<compile_context>
chip_gen: v6e
topology: v6e:2x2x1
jax: 0.10.0
libtpu: 0.0.40
codegen_flags: <defaults>
</compile_context>

<pallas_src>
import jax
import jax.numpy as jnp
from jax.experimental import pallas as pl
from jax.experimental.pallas import tpu as pltpu

NEGVAL = -1000000.0


# --------------------------------------------------------------------------------------
# In-kernel online-softmax step (shared by both attention types)
# --------------------------------------------------------------------------------------
def _attend(ctx, s, emb_ref, attn_ref, m_ref, l_ref, acc_ref):
    """One online-softmax step over an S-tile; finalizes on the last S step.

    ctx: (tb, ts, D) context tile (input dtype).
    s:   (tb, ts) f32 masked logits for this tile.
    """
    k = pl.program_id(1)
    ts = ctx.shape[1]

    @pl.when(k == 0)
    def _():
        m_ref[...] = jnp.full(m_ref.shape, -jnp.inf, dtype=m_ref.dtype)
        l_ref[...] = jnp.zeros(l_ref.shape, l_ref.dtype)
        acc_ref[...] = jnp.zeros(acc_ref.shape, acc_ref.dtype)

    # Stash the raw (masked) logits of this S-slice into the resident attention block;
    # the single normalization pass happens on the last S step.
    if ts == attn_ref.shape[1]:          # single S-tile: whole-block store
        attn_ref[...] = s.astype(attn_ref.dtype)
    else:                                # ts is a multiple of 128 by construction
        start = pl.multiple_of(k * ts, 128)
        attn_ref[:, pl.ds(start, ts)] = s.astype(attn_ref.dtype)

    m_prev = m_ref[...]                                            # (tb, 1)
    m_new = jnp.maximum(m_prev, jnp.max(s, axis=-1, keepdims=True))
    alpha = jnp.exp(m_prev - m_new)                                # (tb, 1)
    p = jnp.exp(s - m_new)                                         # (tb, ts)
    l_ref[...] = alpha * l_ref[...] + jnp.sum(p, axis=-1, keepdims=True)
    # Weighted readout contracting the S-tile on the (otherwise idle) MXU.
    wq = jnp.einsum("bqs,bsd->bqd", p[:, None, :].astype(ctx.dtype), ctx,
                    preferred_element_type=jnp.float32)            # (tb, 1, D)
    acc_ref[...] = alpha[:, :, None] * acc_ref[...] + wq
    m_ref[...] = m_new

    @pl.when(k == pl.num_programs(1) - 1)
    def _():
        inv = pl.reciprocal(l_ref[...], approx=False)              # (tb, 1), exact
        attn_ref[...] = jnp.exp(attn_ref[...] - m_ref[...]) * inv
        emb_ref[...] = (acc_ref[...][:, 0, :] * inv).astype(emb_ref.dtype)


# --------------------------------------------------------------------------------------
# Kernels
# --------------------------------------------------------------------------------------
def _dot_kernel(ctx_ref, mask_ref, wk_ref, emb_ref, attn_ref, m_ref, l_ref, acc_ref):
    ctx = ctx_ref[...]                                             # (tb, ts, D)
    # Fused logits: ctx . (W @ key / T) -- VPU multiply + lane reduce, no MXU matmul.
    s = jnp.sum(ctx * wk_ref[...], axis=-1)                        # (tb, ts) f32
    s = jnp.where(mask_ref[...] > 0, s, NEGVAL)
    _attend(ctx, s, emb_ref, attn_ref, m_ref, l_ref, acc_ref)


def _sum_kernel(ctx_ref, mask_ref, w_ref, bk_ref, w2_ref,
                emb_ref, attn_ref, m_ref, l_ref, acc_ref):
    tb, ts, d = ctx_ref.shape
    kk = w_ref.shape[1]
    ctx = ctx_ref[...]                                             # (tb, ts, D)
    # ts is always a multiple of 8 (wrapper pads S), so merging (tb, ts) is a layout no-op
    # and the projection runs as a single 2-D MXU matmul with a full M = tb*ts dimension.
    proj = jnp.dot(ctx.reshape(tb * ts, d), w_ref[...],
                   preferred_element_type=jnp.float32)             # (tb*ts, K)
    ck = jnp.tanh(proj + bk_ref[...])                              # + (b + key), (1, K)
    # Logits via VPU multiply + lane reduce (w2 already carries 1/temperature).
    s = jnp.sum(ck.reshape(tb, ts, kk) * w2_ref[...], axis=-1)     # (tb, ts)
    s = jnp.where(mask_ref[...] > 0, s, NEGVAL)
    _attend(ctx, s, emb_ref, attn_ref, m_ref, l_ref, acc_ref)


# --------------------------------------------------------------------------------------
# Tile selection (bytes-based, VMEM-budget aware)
# --------------------------------------------------------------------------------------
def _round_up(x, m):
    return ((x + m - 1) // m) * m


def _choose_tiles(B, S, D, itemsize, ctx_tile_bytes):
    """Pick (tb, B_pad, ts, S_pad) so one context tile is ~ctx_tile_bytes and every
    BlockSpec dim is either a multiple of (8, 128) or the full (padded) array dim."""
    s8 = _round_up(S, 8)                    # full-S blocks padded so (tb, ts) merge is free
    slab = s8 * D * itemsize                # one batch row's full-S context
    # 1) Everything fits one tile.
    if B * slab <= ctx_tile_bytes:
        # TODO(synk): on v7x (2 TensorCores) could split large-B cases into >=2 tiles here.
        return B, B, s8, s8
    # 2) Several full-S batch rows per tile (batch tile a multiple of 8).
    if 8 * slab <= ctx_tile_bytes:
        tb = ((ctx_tile_bytes // slab) // 8) * 8
        return tb, _round_up(B, tb), s8, s8
    # 3) A full-S row group is too big: tile S as well (online softmax in the kernel).
    if B <= 8:
        tb, b_pad = B, B
    else:
        tb, b_pad = 8, _round_up(B, 8)
    ts = max(128, ((ctx_tile_bytes // max(tb * D * itemsize, 1)) // 128) * 128)
    if ts >= s8:
        return tb, b_pad, s8, s8
    return tb, b_pad, ts, _round_up(S, ts)


# --------------------------------------------------------------------------------------
# Wrapper
# --------------------------------------------------------------------------------------
def keyed_attention(context, mask, params, *, attn_type="dot", temperature=1.0,
                    dropout=0.0, ctx_tile_bytes=None):
    """Pallas implementation of KeyedAttention.forward.

    context: (B, S, D) float
    mask:    (B, S)    int/bool/float (nonzero = keep, 0 = mask)
    params:  dict with 'W' (D, K), 'b' (K,), 'key' (K, 1)
             and for attn_type='sum': 'W2' (K, 1), 'b2' scalar
    Returns (weighted_emb (B, D), attn_weights (B, S)).
    """
    del dropout  # TODO(synk): attention-weight dropout (training-only RNG) is a no-op here.
    B, S, D = context.shape
    K = params["W"].shape[1]
    inv_t = 1.0 / float(temperature)
    itemsize = jnp.dtype(context.dtype).itemsize

    # Generation-aware VMEM budget (v7x: 64 MiB -> ~48 MiB usable; v5e/v6e: 128 -> ~96 MiB).
    try:
        vmem_cap = int(pltpu.get_tpu_info().vmem_capacity_bytes)
    except Exception:
        vmem_cap = 64 * 2 ** 20
    vmem_limit = (vmem_cap * 3) // 4
    if ctx_tile_bytes is None:
        ctx_tile_bytes = min(8 * 2 ** 20, vmem_limit // 4)   # double-buffered ctx <= limit/2

    tb, B_pad, ts, S_pad = _choose_tiles(B, S, D, itemsize, int(ctx_tile_bytes))
    n_b, n_s = B_pad // tb, S_pad // ts

    # Zero-pad awkward B / S (padded mask entries are 0 -> exactly-zero attention weight).
    if B_pad != B or S_pad != S:
        context = jnp.pad(context, ((0, B_pad - B), (0, S_pad - S), (0, 0)))
        mask = jnp.pad(mask, ((0, B_pad - B), (0, S_pad - S)))

    ctx_spec = pl.BlockSpec((tb, ts, D), lambda i, k: (i, k, 0))
    mask_spec = pl.BlockSpec((tb, ts), lambda i, k: (i, k))
    full2 = lambda i, k: (0, 0)

    if attn_type == "dot":
        # softmax((ctx@W + b)@key / T) == softmax(ctx @ (W@key/T)): fold W, key, 1/T; drop b.
        wk = (jnp.dot(params["W"].astype(jnp.float32),
                      params["key"].astype(jnp.float32)) * inv_t).reshape(1, D)
        kernel = _dot_kernel
        in_specs = [ctx_spec, mask_spec, pl.BlockSpec((1, D), full2)]
        args = (context, mask, wk)
        flops = 4 * B_pad * S_pad * D
        transc = 3 * B_pad * S_pad
    elif attn_type == "sum":
        # Fold bias + key into one additive row; fold 1/T into W2; drop b2 (constant shift).
        bk = (params["b"].astype(jnp.float32)
              + params["key"][:, 0].astype(jnp.float32)).reshape(1, K)
        w2t = (params["W2"][:, 0].astype(jnp.float32) * inv_t).reshape(1, K)
        w = params["W"].astype(context.dtype)          # bf16-rate MXU when ctx is bf16
        kernel = _sum_kernel
        in_specs = [ctx_spec, mask_spec,
                    pl.BlockSpec((D, K), full2),
                    pl.BlockSpec((1, K), full2),
                    pl.BlockSpec((1, K), full2)]
        args = (context, mask, w, bk, w2t)
        flops = 2 * B_pad * S_pad * D * K + 2 * B_pad * S_pad * K + 2 * B_pad * S_pad * D
        transc = 4 * B_pad * S_pad
    else:
        raise ValueError(f"unknown attn_type: {attn_type}")

    out_shape = (
        jax.ShapeDtypeStruct((B_pad, D), context.dtype),     # weighted_emb
        jax.ShapeDtypeStruct((B_pad, S_pad), jnp.float32),   # attn_weights
    )
    out_specs = (
        pl.BlockSpec((tb, D), lambda i, k: (i, 0)),          # resident across the S axis
        pl.BlockSpec((tb, S_pad), lambda i, k: (i, 0)),
    )
    scratch_shapes = [
        pltpu.VMEM((tb, 1), jnp.float32),                    # running max
        pltpu.VMEM((tb, 1), jnp.float32),                    # running denominator
        pltpu.VMEM((tb, 1, D), jnp.float32),                 # running weighted-sum acc
    ]

    mask_item = jnp.dtype(mask.dtype).itemsize
    bytes_accessed = int(itemsize * B_pad * S_pad * D            # context stream (dominant)
                         + mask_item * B_pad * S_pad             # mask
                         + itemsize * B_pad * D + 4 * B_pad * S_pad   # outputs
                         + 4 * (D * K + 3 * K + D))              # weights
    cost = pl.CostEstimate(flops=int(flops), transcendentals=int(transc),
                           bytes_accessed=bytes_accessed)

    emb, attn = pl.pallas_call(
        kernel,
        out_shape=out_shape,
        grid=(n_b, n_s),
        in_specs=in_specs,
        out_specs=out_specs,
        scratch_shapes=scratch_shapes,
        compiler_params=pltpu.CompilerParams(
            dimension_semantics=("parallel", "arbitrary"),
            vmem_limit_bytes=int(vmem_limit)),
        cost_estimate=cost,
    )(*args)

    return emb[:B], attn[:B, :S]


# --------------------------------------------------------------------------------------
# Plain-JAX reference (mirrors the PyTorch forward exactly, unfused)
# --------------------------------------------------------------------------------------
def keyed_attention_ref(context, mask, params, *, attn_type="dot", temperature=1.0):
    hi = jax.lax.Precision.HIGHEST
    proj = jnp.einsum("bsd,dk->bsk", context, params["W"], precision=hi) + params["b"]
    if attn_type == "dot":
        logits = jnp.einsum("bsk,kl->bsl", proj, params["key"], precision=hi)[..., 0]
    else:
        ck = jnp.tanh(proj + params["key"].reshape(1, 1, -1))
        logits = (jnp.einsum("bsk,kl->bsl", ck, params["W2"], precision=hi)
                  + params["b2"])[..., 0]
    logits = logits / temperature
    fm = mask.astype(jnp.float32)
    logits = fm * logits + (1.0 - fm) * NEGVAL
    attn = jax.nn.softmax(logits, axis=-1)
    emb = jnp.einsum("bs,bsd->bd", attn, context, precision=hi)
    return emb, attn


def init_params(key_dim, ctxt_dim, attn_type, seed=0):
    """Deterministic synthetic parameters matching the module's shapes."""
    k = jax.random.PRNGKey(seed)
    k1, k2, k3, k4, k5 = jax.random.split(k, 5)
    bound = 1.0 / jnp.sqrt(ctxt_dim)
    params = {
        # nn.Linear(ctxt_dim, key_dim): weight (key_dim, ctxt_dim); stored transposed.
        "W": jax.random.uniform(k1, (ctxt_dim, key_dim), jnp.float32, -bound, bound),
        "b": jax.random.uniform(k2, (key_dim,), jnp.float32, -bound, bound),
        # nn.Parameter(torch.Tensor(key_dim, 1).uniform_(-0.01, 0.01))
        "key": jax.random.uniform(k3, (key_dim, 1), jnp.float32, -0.01, 0.01),
    }
    if attn_type == "sum":
        bound2 = 1.0 / jnp.sqrt(key_dim)
        params["W2"] = jax.random.uniform(k4, (key_dim, 1), jnp.float32, -bound2, bound2)
        params["b2"] = jax.random.uniform(k5, (), jnp.float32, -bound2, bound2)
    return params


if __name__ == "__main__":
    rk = jax.random.PRNGKey(0)

    # (B, S, D, K, temperature, ctx_tile_bytes override) -- overrides force the
    # S-tiling / padding code paths at small, fast shapes.
    configs = [
        (2, 8, 32, 16, 2.0, None),            # tiny, single-tile path
        (2, 256, 128, 16, 1.0, 128 * 1024),   # forces S-tiling (online softmax, 2 S steps)
        (3, 200, 64, 8, 1.5, 64 * 1024),      # S-tiling + S padding (200 -> 256)
        (20, 16, 32, 16, 1.0, 4 * 1024),      # batch tiling + B padding (20 -> 24)
    ]

    ok = True
    for idx, (B, S, D, K, temp, tile_bytes) in enumerate(configs):
        kc, km = jax.random.split(jax.random.fold_in(rk, idx))
        context = jax.random.normal(kc, (B, S, D), jnp.float32)
        # Random 0/1 mask; keep position 0 always valid so no real row is fully masked.
        mask = (jax.random.uniform(km, (B, S)) > 0.3).astype(jnp.int32)
        mask = mask.at[:, 0].set(1)
        for attn_type in ("dot", "sum"):
            params = init_params(K, D, attn_type, seed=idx)
            emb, attn = keyed_attention(context, mask, params, attn_type=attn_type,
                                        temperature=temp, ctx_tile_bytes=tile_bytes)
            jax.block_until_ready((emb, attn))
            emb_r, attn_r = keyed_attention_ref(context, mask, params,
                                                attn_type=attn_type, temperature=temp)
            ok &= bool(jnp.allclose(emb, emb_r, atol=1e-5, rtol=1e-4))
            ok &= bool(jnp.allclose(attn, attn_r, atol=1e-5, rtol=1e-4))

    if ok:
        print("KERNEL_OK")
    else:
        print("MISMATCH")
</pallas_src>

<mosaic_0001>
module attributes {stable_mosaic.version = 11 : i64} {
  func.func @_dot_kernel(%arg0: i32, %arg1: i32, %arg2: memref<2x8x32xf32, #tpu.memory_space<vmem>>, %arg3: memref<2x8xi32, #tpu.memory_space<vmem>>, %arg4: memref<1x32xf32, #tpu.memory_space<vmem>>, %arg5: memref<2x32xf32, #tpu.memory_space<vmem>>, %arg6: memref<2x8xf32, #tpu.memory_space<vmem>>, %arg7: memref<2x1xf32, #tpu.memory_space<vmem>>, %arg8: memref<2x1xf32, #tpu.memory_space<vmem>>, %arg9: memref<2x1x32xf32, #tpu.memory_space<vmem>>) attributes {dimension_semantics = [#tpu.dimension_semantics<parallel>, #tpu.dimension_semantics<arbitrary>], iteration_bounds = array<i64: 1, 1>, scalar_prefetch = 0 : i64, scratch_operands = 3 : i64, tpu.core_type = #tpu.core_type<tc>, window_params = [{transform_indices = @transform_0, window_bounds = array<i64: 2, 8, 32>}, {transform_indices = @transform_1, window_bounds = array<i64: 2, 8>}, {pipeline_mode = #tpu.pipeline_mode<synchronous>, transform_indices = @transform_2, window_bounds = array<i64: 1, 32>}, {transform_indices = @transform_3, window_bounds = array<i64: 2, 32>}, {transform_indices = @transform_4, window_bounds = array<i64: 2, 8>}]} {
    %c0 = arith.constant 0 : index
    %c0_0 = arith.constant 0 : index
    %c0_1 = arith.constant 0 : index
    %0 = vector.load %arg2[%c0, %c0_0, %c0_1] : memref<2x8x32xf32, #tpu.memory_space<vmem>>, vector<2x8x32xf32>
    %c0_2 = arith.constant 0 : index
    %c0_3 = arith.constant 0 : index
    %1 = vector.load %arg4[%c0_2, %c0_3] : memref<1x32xf32, #tpu.memory_space<vmem>>, vector<1x32xf32>
    %2 = vector.shape_cast %1 : vector<1x32xf32> to vector<1x1x32xf32>
    %3 = vector.broadcast %2 : vector<1x1x32xf32> to vector<2x8x32xf32>
    %4 = arith.mulf %0, %3 : vector<2x8x32xf32>
    %cst = arith.constant dense<0.000000e+00> : vector<2x8xf32>
    %5 = vector.multi_reduction <add>, %4, %cst [2] : vector<2x8x32xf32> to vector<2x8xf32>
    %c0_4 = arith.constant 0 : index
    %c0_5 = arith.constant 0 : index
    %6 = vector.load %arg3[%c0_4, %c0_5] : memref<2x8xi32, #tpu.memory_space<vmem>>, vector<2x8xi32>
    %c0_i32 = arith.constant 0 : i32
    %7 = vector.broadcast %c0_i32 : i32 to vector<2x8xi32>
    %8 = arith.cmpi sgt, %6, %7 : vector<2x8xi32>
    %cst_6 = arith.constant -1.000000e+06 : f32
    %9 = vector.broadcast %cst_6 : f32 to vector<2x8xf32>
    %10 = arith.select %8, %5, %9 : vector<2x8xi1>, vector<2x8xf32>
    %c0_i32_7 = arith.constant 0 : i32
    %11 = arith.cmpi eq, %arg1, %c0_i32_7 : i32
    %12 = arith.extui %11 : i1 to i32
    %c0_i32_8 = arith.constant 0 : i32
    %13 = arith.cmpi ne, %12, %c0_i32_8 : i32
    scf.if %13 {
      %cst_30 = arith.constant 0xFF800000 : f32
      %42 = vector.broadcast %cst_30 : f32 to vector<2x1xf32>
      %c0_31 = arith.constant 0 : index
      %c0_32 = arith.constant 0 : index
      %43 = vector.load %arg7[%c0_31, %c0_32] : memref<2x1xf32, #tpu.memory_space<vmem>>, vector<2x1xf32>
      tpu.vector_store %arg7[%c0_31, %c0_32], %42 {strides = array<i32>} : memref<2x1xf32, #tpu.memory_space<vmem>>, vector<2x1xf32>,
      %cst_33 = arith.constant 0.000000e+00 : f32
      %44 = vector.broadcast %cst_33 : f32 to vector<2x1xf32>
      %c0_34 = arith.constant 0 : index
      %c0_35 = arith.constant 0 : index
      %45 = vector.load %arg8[%c0_34, %c0_35] : memref<2x1xf32, #tpu.memory_space<vmem>>, vector<2x1xf32>
      tpu.vector_store %arg8[%c0_34, %c0_35], %44 {strides = array<i32>} : memref<2x1xf32, #tpu.memory_space<vmem>>, vector<2x1xf32>,
      %cst_36 = arith.constant 0.000000e+00 : f32
      %46 = vector.broadcast %cst_36 : f32 to vector<2x1x32xf32>
      %c0_37 = arith.constant 0 : index
      %c0_38 = arith.constant 0 : index
      %c0_39 = arith.constant 0 : index
      %47 = vector.load %arg9[%c0_37, %c0_38, %c0_39] : memref<2x1x32xf32, #tpu.memory_space<vmem>>, vector<2x1x32xf32>
      tpu.vector_store %arg9[%c0_37, %c0_38, %c0_39], %46 {strides = array<i32>} : memref<2x1x32xf32, #tpu.memory_space<vmem>>, vector<2x1x32xf32>,
    } else {
    }
    %c0_9 = arith.constant 0 : index
    %c0_10 = arith.constant 0 : index
    %14 = vector.load %arg6[%c0_9, %c0_10] : memref<2x8xf32, #tpu.memory_space<vmem>>, vector<2x8xf32>
    tpu.vector_store %arg6[%c0_9, %c0_10], %10 {strides = array<i32>} : memref<2x8xf32, #tpu.memory_space<vmem>>, vector<2x8xf32>,
    %c0_11 = arith.constant 0 : index
    %c0_12 = arith.constant 0 : index
    %15 = vector.load %arg7[%c0_11, %c0_12] : memref<2x1xf32, #tpu.memory_space<vmem>>, vector<2x1xf32>
    %cst_13 = arith.constant dense<0xFF800000> : vector<2xf32>
    %16 = vector.multi_reduction <maximumf>, %10, %cst_13 [1] : vector<2x8xf32> to vector<2xf32>
    %17 = vector.shape_cast %16 : vector<2xf32> to vector<2x1xf32>
    %18 = arith.maximumf %15, %17 : vector<2x1xf32>
    %19 = arith.subf %15, %18 : vector<2x1xf32>
    %20 = math.exp %19 : vector<2x1xf32>
    %21 = vector.broadcast %18 : vector<2x1xf32> to vector<2x8xf32>
    %22 = arith.subf %10, %21 : vector<2x8xf32>
    %23 = math.exp %22 : vector<2x8xf32>
    %c0_14 = arith.constant 0 : index
    %c0_15 = arith.constant 0 : index
    %24 = vector.load %arg8[%c0_14, %c0_15] : memref<2x1xf32, #tpu.memory_space<vmem>>, vector<2x1xf32>
    %25 = arith.mulf %20, %24 : vector<2x1xf32>
    %cst_16 = arith.constant dense<0.000000e+00> : vector<2xf32>
    %26 = vector.multi_reduction <add>, %23, %cst_16 [1] : vector<2x8xf32> to vector<2xf32>
    %27 = vector.shape_cast %26 : vector<2xf32> to vector<2x1xf32>
    %28 = arith.addf %25, %27 : vector<2x1xf32>
    %c0_17 = arith.constant 0 : index
    %c0_18 = arith.constant 0 : index
    %29 = vector.load %arg8[%c0_17, %c0_18] : memref<2x1xf32, #tpu.memory_space<vmem>>, vector<2x1xf32>
    tpu.vector_store %arg8[%c0_17, %c0_18], %28 {strides = array<i32>} : memref<2x1xf32, #tpu.memory_space<vmem>>, vector<2x1xf32>,
    %30 = vector.shape_cast %23 : vector<2x8xf32> to vector<2x1x8xf32>
    "tpu.trace_start"() <{level = 10 : i32, message = "bqs,bsd->bqd"}> : () -> ()
    %cst_19 = arith.constant dense<0.000000e+00> : vector<2x1x32xf32>
    %31 = tpu.matmul %30, %0, %cst_19 {dimension_numbers = #tpu.dot_dimension_numbers<[2], [1], [1], [2], [0, 0, 0, 1, 1, 2], [0], [0]>} : vector<2x1x8xf32>, vector<2x8x32xf32>, vector<2x1x32xf32> -> vector<2x1x32xf32>
    "tpu.trace_stop"() : () -> ()
    %32 = vector.shape_cast %20 : vector<2x1xf32> to vector<2x1x1xf32>
    %c0_20 = arith.constant 0 : index
    %c0_21 = arith.constant 0 : index
    %c0_22 = arith.constant 0 : index
    %33 = vector.load %arg9[%c0_20, %c0_21, %c0_22] : memref<2x1x32xf32, #tpu.memory_space<vmem>>, vector<2x1x32xf32>
    %34 = vector.broadcast %32 : vector<2x1x1xf32> to vector<2x1x32xf32>
    %35 = arith.mulf %34, %33 : vector<2x1x32xf32>
    %36 = arith.addf %35, %31 : vector<2x1x32xf32>
    %c0_23 = arith.constant 0 : index
    %c0_24 = arith.constant 0 : index
    %c0_25 = arith.constant 0 : index
    %37 = vector.load %arg9[%c0_23, %c0_24, %c0_25] : memref<2x1x32xf32, #tpu.memory_space<vmem>>, vector<2x1x32xf32>
    tpu.vector_store %arg9[%c0_23, %c0_24, %c0_25], %36 {strides = array<i32>} : memref<2x1x32xf32, #tpu.memory_space<vmem>>, vector<2x1x32xf32>,
    %c0_26 = arith.constant 0 : index
    %c0_27 = arith.constant 0 : index
    %38 = vector.load %arg7[%c0_26, %c0_27] : memref<2x1xf32, #tpu.memory_space<vmem>>, vector<2x1xf32>
    tpu.vector_store %arg7[%c0_26, %c0_27], %18 {strides = array<i32>} : memref<2x1xf32, #tpu.memory_space<vmem>>, vector<2x1xf32>,
    %c0_i32_28 = arith.constant 0 : i32
    %39 = arith.cmpi eq, %arg1, %c0_i32_28 : i32
    %40 = arith.extui %39 : i1 to i32
    %c0_i32_29 = arith.constant 0 : i32
    %41 = arith.cmpi ne, %40, %c0_i32_29 : i32
    scf.if %41 {
      %c0_30 = arith.constant 0 : index
      %c0_31 = arith.constant 0 : index
      %42 = vector.load %arg8[%c0_30, %c0_31] : memref<2x1xf32, #tpu.memory_space<vmem>>, vector<2x1xf32>
      %43 = tpu.reciprocal %42 : vector<2x1xf32> -> vector<2x1xf32>
      %c0_32 = arith.constant 0 : index
      %c0_33 = arith.constant 0 : index
      %44 = vector.load %arg6[%c0_32, %c0_33] : memref<2x8xf32, #tpu.memory_space<vmem>>, vector<2x8xf32>
      %c0_34 = arith.constant 0 : index
      %c0_35 = arith.constant 0 : index
      %45 = vector.load %arg7[%c0_34, %c0_35] : memref<2x1xf32, #tpu.memory_space<vmem>>, vector<2x1xf32>
      %46 = vector.broadcast %45 : vector<2x1xf32> to vector<2x8xf32>
      %47 = arith.subf %44, %46 : vector<2x8xf32>
      %48 = math.exp %47 : vector<2x8xf32>
      %49 = vector.broadcast %43 : vector<2x1xf32> to vector<2x8xf32>
      %50 = arith.mulf %48, %49 : vector<2x8xf32>
      %c0_36 = arith.constant 0 : index
      %c0_37 = arith.constant 0 : index
      %51 = vector.load %arg6[%c0_36, %c0_37] : memref<2x8xf32, #tpu.memory_space<vmem>>, vector<2x8xf32>
      tpu.vector_store %arg6[%c0_36, %c0_37], %50 {strides = array<i32>} : memref<2x8xf32, #tpu.memory_space<vmem>>, vector<2x8xf32>,
      %c0_38 = arith.constant 0 : index
      %c0_39 = arith.constant 0 : index
      %c0_40 = arith.constant 0 : index
      %52 = vector.load %arg9[%c0_38, %c0_39, %c0_40] : memref<2x1x32xf32, #tpu.memory_space<vmem>>, vector<2x1x32xf32>
      %53 = vector.shape_cast %52 : vector<2x1x32xf32> to vector<2x32xf32>
      %54 = vector.broadcast %43 : vector<2x1xf32> to vector<2x32xf32>
      %55 = arith.mulf %53, %54 : vector<2x32xf32>
      %c0_41 = arith.constant 0 : index
      %c0_42 = arith.constant 0 : index
      %56 = vector.load %arg5[%c0_41, %c0_42] : memref<2x32xf32, #tpu.memory_space<vmem>>, vector<2x32xf32>
      tpu.vector_store %arg5[%c0_41, %c0_42], %55 {strides = array<i32>} : memref<2x32xf32, #tpu.memory_space<vmem>>, vector<2x32xf32>,
    } else {
    }
    return
  }
  func.func @transform_0(%arg0: i32, %arg1: i32) -> (i32, i32, i32) {
    %c0_i32 = arith.constant 0 : i32
    %c0_i32_0 = arith.constant 0 : i32
    return %arg0, %arg1, %c0_i32 : i32, i32, i32
  }
  func.func @transform_1(%arg0: i32, %arg1: i32) -> (i32, i32) {
    %c0_i32 = arith.constant 0 : i32
    return %arg0, %arg1 : i32, i32
  }
  func.func @transform_2(%arg0: i32, %arg1: i32) -> (i32, i32) {
    %c0_i32 = arith.constant 0 : i32
    %c0_i32_0 = arith.constant 0 : i32
    %c0_i32_1 = arith.constant 0 : i32
    return %c0_i32, %c0_i32_0 : i32, i32
  }
  func.func @transform_3(%arg0: i32, %arg1: i32) -> (i32, i32) {
    %c0_i32 = arith.constant 0 : i32
    %c0_i32_0 = arith.constant 0 : i32
    return %arg0, %c0_i32 : i32, i32
  }
  func.func @transform_4(%arg0: i32, %arg1: i32) -> (i32, i32) {
    %c0_i32 = arith.constant 0 : i32
    %c0_i32_0 = arith.constant 0 : i32
    return %arg0, %c0_i32 : i32, i32
  }
}

</mosaic_0001>

<bundles_post_ra>
// kernel: tpu_custom_call.1
= control target key start
LH: loop header
LB: loop body
LE: loop exit
PB: predicated region body
PF: predicated region fallthrough
CT: control target
= control target key end

     0   :  { %10 = vsyncpa [#allocation6], 0  ;;  %s624_s0 = inlined_call_operand.hbm [shape: f32[2,8,32], index: 0, kind: input, shape index: {}]   ;;  %s625_s1 = inlined_call_operand.hbm [shape: s32[2,8], index: 1, kind: input, shape index: {}]   ;;  %s626_s2 = inlined_call_operand.vmem [shape: f32[1,32], index: 2, kind: input, shape index: {}]   ;;  %s627_s3 = inlined_call_operand.hbm [shape: f32[2,32], index: 3, kind: output, shape index: {0}]   ;;  %s628_s4 = inlined_call_operand.hbm [shape: f32[2,8], index: 4, kind: output, shape index: {1}]  }
   0x1   :  { %11 = vsyncpa [#allocation9], 0 }
   0x2   :  { %12 = vsyncpa [#allocation7], 0 }
   0x3   :  { %13 = vsyncpa [#allocation12], 0  ;;  %s545_s15 = smov [#allocation5]  }
   0x4   :  { %s19_s16 = sshll.u32 %s545_s15, 4  ;;  %s20_s16 = int_to_ptr.vmem [resolvable:$true] %s19_s16 }
   0x5   :  { %s465_s17 = scalar_lea.vmem %s20_s16, 256  ;;  %p470_p1 = scmp.lt.s32.totalorder %s20_s16, %s20_s16 }
   0x6   :  { %p466_p0 = scmp.ne.s32.totalorder %s20_s16, %s465_s17  ;;  %p471_p2 = scmp.lt.s32.totalorder %s465_s17, %s465_s17 }
   0x8   :  { %p472_p3 = por %p471_p2, %p470_p1 }
   0xa   :  { %p473_p4 = pnand %p472_p3, %p466_p0 }
   0xc   :  { %476 = shalt.err (!%p473_p4)
}
   0xd   :  { %s546_s18 = smov 128   ;;  %s547_s19 = smov 8  }
   0xe   :  { %25 = dma.hbm_to_vmem [thread:$0]  %s624_s0, 256, %s20_s16, [#allocation6], %s546_s18, %s546_s18, %s547_s19  }
   0xf   :  { %s548_s22 = smov [#allocation8]  }
  0x10   :  { %s32_s23 = sshll.u32 %s548_s22, 4  ;;  %s33_s23 = int_to_ptr.vmem [resolvable:$true] %s32_s23 }
  0x11   :  { %s485_s24 = scalar_lea.vmem %s33_s23, 32  ;;  %p490_p6 = scmp.lt.s32.totalorder %s33_s23, %s33_s23 }
  0x12   :  { %p486_p5 = scmp.ne.s32.totalorder %s33_s23, %s485_s24  ;;  %p491_p7 = scmp.lt.s32.totalorder %s485_s24, %s485_s24 }
  0x14   :  { %p492_p8 = por %p491_p7, %p490_p6 }
  0x16   :  { %p493_p9 = pnand %p492_p8, %p486_p5 }
  0x18   :  { %496 = shalt.err (!%p493_p9)
}
  0x19   :  { %35 = dma.hbm_to_vmem [thread:$0]  %s625_s1, 32, %s33_s23, [#allocation9]  }
  0x1a   :  { %537 = dma.done.wait [#allocation6], 256  }
  0x1b   :  { %538 = vsyncadd [#allocation6], 4294967040 }
  0x1c   :  { %539 = dma.done.wait [#allocation9], 32  }
  0x1d   :  { %540 = vsyncadd [#allocation9], 4294967264  ;;  %v44_v0 = vld [vmem:[#allocation5] sm:$0xff]  ;;  %v419_v1 = vld [vmem:[%s626_s2] ss:$0 sm:$0xff]  ;;  %vm55_vm0 = vcmask 261120   ;;  %v66_v8 = vlaneseq }
  0x1e   :  { %v45_v2 = vld [vmem:[#allocation5 + $0x8] sm:$0xff]  ;;  %v53_v3 = vmul.f32 %v419_v1, %v44_v0  ;;  %vm84_vm1 = vcmask 1024   ;;  %v549_v7 = vmov -inf   ;;  %v62_v13 = vld [vmem:[#allocation8] sm:$0x3]  ;;  %vm76_vm2 = vcmask 1041409  }
  0x1f   :  { %v54_v4 = vmul.f32 %v419_v1, %v45_v2  ;;  %85 = vst.msk [vmem:[#allocation2] sm:$0x3] %vm84_vm1, %v549_v7  ;;  %v67_v9 = vand.u32 127, %v66_v8  ;;  %v591_v10 = vshrl.u32 %v66_v8, 7  ;;  %vm63_vm3 = vcmp.gt.s32.totalorder %v62_v13, 0  ;;  %s554_s1 = smov [#allocation11]  }
  0x20   :  { %v56_v5 = vsel %vm55_vm0, %v53_v3, 0.0  ;;  %vm90_vm4 = vcmask 58368   ;;  %v550_v20 = vmov 0   ;;  %v551_v21 = vmov 0.0   ;;  %s405_s2 = sshll.u32 %s554_s1, 4  ;;  %s406_s2 = int_to_ptr.vmem [resolvable:$true] %s405_s2 }
  0x21   :  { %57 = vadd.xlane.f32.xlu0 %v56_v5  ;;  %v59_v6 = vsel %vm55_vm0, %v54_v4, 0.0  ;;  %v70_v12 = vsub.s32 %v67_v9, %v591_v10  ;;  %447 = vset.pattern.permute.xlu1 %v550_v20  ;;  %86 = vst.msk [vmem:[#allocation3] sm:$0x3] %vm84_vm1, %v551_v21  ;;  %v552_v27 = vmov 1966171168   ;;  %vm87_vm5 = vcmask 253952   ;;  %p502_p11 = scmp.lt.s32.totalorder %s406_s2, %s406_s2 }
  0x22   :  { %448 = vset.pattern.permute.xlu0 %v550_v20  ;;  %426 = vmatprep.subr.mxu0 %v551_v21  ;;  %v118_v28 = vunpack.c.l.s4 %v552_v27  ;;  %88 = vst.msk [vmem:[#allocation4] sm:$0x1] %vm87_vm5, %v551_v21  ;;  %89 = vst.msk [vmem:[#allocation4 + $0x1] sm:$0x1] %vm87_vm5, %v551_v21  ;;  %vm553_vm6 = vmmov 0   ;;  %vm139_vm7 = vcmask 64512  }
  0x23   :  { %431 = vmatprep.subr.mxu1 %v551_v21  ;;  %427 = vmatpush3.msra.mxu0 %v44_v0  ;;  %v315_v53 = vsub.s32 0, %v591_v10  ;;  %v363_v7 = vsub.s32 1, %v591_v10  ;;  %s497_s28 = scalar_lea.vmem %s406_s2, 32 }
  0x24   :  { %432 = vmatpush3.msra.mxu1 %v45_v2  ;;  %v119_v29 = vunpack.c.0.s8 %v118_v28  ;;  %428 = vmatprep.mubr.msk.f32.mxu0 %vm553_vm6, %v551_v21  ;;  %p498_p10 = scmp.ne.s32.totalorder %s406_s2, %s497_s28  ;;  %p503_p12 = scmp.lt.s32.totalorder %s497_s28, %s497_s28 }
  0x25   :  { %60 = vadd.xlane.f32.xlu0 %v59_v6  ;;  %433 = vmatprep.mubr.msk.f32.mxu1 %vm553_vm6, %v551_v21 }
  0x26   :  { %v92_v22 = vld [vmem:[#allocation2] sm:$0x3]  ;;  %v599_v30 = vsub.s32 %v119_v29, %v591_v10  ;;  %p504_p13 = por %p503_p12, %p502_p11 }
  0x28   :  { %v108_v46 = vld [vmem:[#allocation3] sm:$0x3]  ;;  %p505_p0 = pnand %p504_p13, %p498_p10 }
  0x29   :  { %v307_v56 = vld [vmem:[#allocation4] sm:$0x1]  ;;  %v308_v58 = vld [vmem:[#allocation4 + $0x1] sm:$0x1] }
  0xaa   :  { %v58_v11 = vpop.xlane.xlu0 %57 }
  0xab   :  { %v71_v15 = vrot.slane %v58_v11, %v70_v12 }
  0xae   :  { %v61_v14 = vpop.xlane.xlu0 %60 }
  0xaf   :  { %v75_v16 = vrot.slane %v61_v14, %v70_v12 }
  0xb1   :  { %v77_v17 = vsel %vm76_vm2, %v75_v16, %v71_v15 }
  0xb2   :  { %v79_v18 = vsel %vm63_vm3, %v77_v17, -1000000.0 }
  0xb3   :  { %v93_v19 = vsel %vm90_vm4, %v79_v18, -inf  ;;  %91 = vst.msk [vmem:[#allocation11] sm:$0x3] %vm90_vm4, %v79_v18 }
  0xb4   :  { %94 = vmax.xlane.f32.xlu1 %v93_v19 }
  0xba   :  { %v338_v4 = vld [vmem:[#allocation11] sm:$0x3] }
 0x13d   :  { %v95_v23 = vpop.xlane.xlu1 %94 }
 0x13e   :  { %v96_v24 = vmax.f32 %v92_v22, %v95_v23 }
 0x140   :  { %v97_v25 = vsub.f32 %v92_v22, %v96_v24  ;;  %332 = vst.msk [vmem:[#allocation2] sm:$0x3] %vm84_vm1, %v96_v24  ;;  %102 = vperm.xlu1 %447, %v96_v24  }
 0x142   :  { %v98_v26 = vmul.f32 1.442695, %v97_v25 }
 0x144   :  { %449 = vpow2.f32 %v98_v26 }
 0x147   :  { %v339_v35 = vld [vmem:[#allocation2] sm:$0x3] }
 0x151   :  { %v450_v31 = vpop.eup %449 }
 0x152   :  { %v291_v32 = vrot.slane %v450_v31, %v599_v30  ;;  %v109_v47 = vmul.f32 %v450_v31, %v108_v46 }
 0x154   :  { %v292_v33 = vcombine.high %v291_v32, %v291_v32  ;;  %v299_v45 = vrot.slane %v291_v32, %v599_v30 }
 0x156   :  { %v306_v34 = vrot.slane %v292_v33, %v599_v30 }
 0x158   :  { %318 = vperm.xlu1 %447, %v306_v34  }
 0x15c   :  { %342 = vperm.xlu1 %447, %v339_v35  }
 0x1bb   :  { %v103_v36 = vpop.permute.xlu1 %102 }
 0x1bc   :  { %v105_v37 = vsub.f32 %v79_v18, %v103_v36 }
 0x1be   :  { %v106_v38 = vmul.f32 1.442695, %v105_v37 }
 0x1c0   :  { %451 = vpow2.f32 %v106_v38 }
 0x1cd   :  { %v452_v39 = vpop.eup %451 }
 0x1ce   :  { %v110_v40 = vsel %vm90_vm4, %v452_v39, 0.0  ;;  %v123_v41 = vrot.slane %v452_v39, %v599_v30 }
 0x1cf   :  { %111 = vadd.xlane.f32.xlu0 %v110_v40 }
 0x1d0   :  { %v131_v42 = vrot.slane %v123_v41, %v599_v30  ;;  %v124_v43 = vcombine.high %v123_v41, %v123_v41 }
 0x1d2   :  { %429 = vmatmul.mubr.msk.f32.vlgmr.msra.gmra.mxu0 %vm139_vm7, %v131_v42  ;;  %v138_v44 = vrot.slane %v124_v43, %v599_v30 }
 0x1d3   :  { %v319_v54 = vpop.permute.xlu1 %318 }
 0x1d4   :  { %434 = vmatmul.mubr.msk.f32.vlgmr.msra.gmra.mxu1 %vm139_vm7, %v138_v44  ;;  %v324_v57 = vrot.slane %v319_v54, %v315_v53 }
 0x1d6   :  { %v326_v62 = vmul.f32 %v324_v57, %v308_v58 }
 0x1d7   :  { %v343_v3 = vpop.permute.xlu1 %342 }
 0x1d8   :  { %v345_v5 = vsub.f32 %v338_v4, %v343_v3 }
 0x1da   :  { %v346_v6 = vmul.f32 1.442695, %v345_v5 }
 0x1e5   :  { %310 = vperm.xlu0 %448, %v299_v45  }
 0x258   :  { %v112_v48 = vpop.xlane.xlu0 %111 }
 0x259   :  { %v113_v49 = vadd.f32 %v112_v48, %v109_v47 }
 0x25b   :  { %115 = vst.msk [vmem:[#allocation3] sm:$0x3] %vm84_vm1, %v113_v49 }
 0x260   :  { %v311_v52 = vpop.permute.xlu0 %310 }
 0x261   :  { %v316_v55 = vrot.slane %v311_v52, %v315_v53 }
 0x262   :  { %v336_v50 = vld [vmem:[#allocation3] sm:$0x3] }
 0x263   :  { %453 = vrcp.f32 %v336_v50  ;;  %v325_v59 = vmul.f32 %v316_v55, %v307_v56 }
 0x264   :  { %455 = vpow2.f32 %v346_v6 }
 0x270   :  { %v454_v51 = vpop.eup %453 }
 0x271   :  { %350 = vperm.xlu1 %447, %v454_v51   ;;  %v456_v8 = vpop.eup %455 }
 0x292   :  { %v208_v60 = vpop.f32.mrf.mxu0 }
 0x293   :  { %v327_v61 = vadd.f32 %v325_v59, %v208_v60 }
 0x294   :  { %v430_v63 = vpop.f32.mrf.mxu0  ;;  %v280_v0 = vpop.f32.mrf.mxu1 }
 0x295   :  { %330 = vst.msk [vmem:[#allocation4] sm:$0x1] %vm87_vm5, %v327_v61  ;;  %v328_v1 = vadd.f32 %v326_v62, %v280_v0 }
 0x296   :  { %v435_v2 = vpop.f32.mrf.mxu1 }
 0x297   :  { %331 = vst.msk [vmem:[#allocation4 + $0x1] sm:$0x1] %vm87_vm5, %v328_v1 }
 0x29c   :  { %v355_v14 = vld [vmem:[#allocation4] sm:$0x1] }
 0x29e   :  { %v356_v15 = vld [vmem:[#allocation4 + $0x1] sm:$0x1] }
 0x2ec   :  { %v351_v9 = vpop.permute.xlu1 %350 }
 0x2ed   :  { %v353_v11 = vmul.f32 %v456_v8, %v351_v9  ;;  %v360_v12 = vrot.slane %v351_v9, %v315_v53  ;;  %v364_v13 = vrot.slane %v351_v9, %v363_v7 }
 0x2ef   :  { %v367_v16 = vmul.f32 %v360_v12, %v355_v14  ;;  %v368_v17 = vmul.f32 %v364_v13, %v356_v15  ;;  %354 = vst.msk [vmem:[#allocation11] sm:$0x3] %vm90_vm4, %v353_v11 }
 0x2f0   :  { %508 = shalt.err (!%p505_p0)
}
 0x2f1   :  { %408 = dma.vmem_to_hbm [thread:$0]  %s406_s2, 32, %s628_s4, [#allocation12]   ;;  %v371_v10 = vcombine.low %v367_v16, %v368_v17  ;;  %vm387_vm8 = vcmask 254976  }
 0x2f2   :  { %s555_s5 = smov [#allocation10]  }
 0x2f3   :  { %s395_s6 = sshll.u32 %s555_s5, 4  ;;  %v378_v18 = vrot.slane %v371_v10, %v599_v30  ;;  %s396_s6 = int_to_ptr.vmem [resolvable:$true] %s395_s6 }
 0x2f4   :  { %s517_s7 = scalar_lea.vmem %s396_s6, 32  ;;  %p522_p2 = scmp.lt.s32.totalorder %s396_s6, %s396_s6 }
 0x2f5   :  { %v385_v19 = vrot.slane %v378_v18, %v599_v30  ;;  %p518_p1 = scmp.ne.s32.totalorder %s396_s6, %s517_s7  ;;  %p523_p3 = scmp.lt.s32.totalorder %s517_s7, %s517_s7 }
 0x2f7   :  { %388 = vst.msk [vmem:[#allocation10] sm:$0x3] %vm387_vm8, %v385_v19  ;;  %p524_p4 = por %p523_p3, %p522_p2 }
 0x2f9   :  { %p525_p5 = pnand %p524_p4, %p518_p1 }
 0x2fb   :  { %528 = shalt.err (!%p525_p5)
}
 0x2fc   :  { %398 = dma.vmem_to_hbm [thread:$0]  %s396_s6, 32, %s627_s3, [#allocation7]  }
 0x2fd   :  { %541 = dma.done.wait [#allocation7], 32  }
 0x2fe   :  { %542 = vsyncadd [#allocation7], 4294967264 }
 0x2ff   :  { %543 = dma.done.wait [#allocation12], 32  }
 0x300   :  { %544 = vsyncadd [#allocation12], 4294967264 }
 0x301   :  { %415 = vsyncpa [#allocation6], 1 }
 0x302   :  { %416 = vsyncpa [#allocation9], 1 }
 0x303   :  { %417 = vsyncpa [#allocation7], 1 }
 0x304   :  { %418 = vsyncpa [#allocation12], 1 }

</bundles_post_ra>
